<compile_context>
chip_gen: v7x
topology: tpu7x:2x2x1
jax: 0.10.0
libtpu: 0.0.40
codegen_flags: <defaults>
</compile_context>

<pallas_src>
import jax
import jax.numpy as jnp
from jax.experimental import pallas as pl
from jax.experimental.pallas import tpu as pltpu


# ~4 MiB per-batch-block byte budget for the dominant tiles: large enough to
# sit near the measured HBM-roofline sweet spot (512+ row tiles), small
# enough that double-buffered sim + hots + out tiles plus in-kernel f32
# temporaries stay far below the 32 MiB scoped-VMEM limit on every
# generation (v5e/v6e 128 MiB physical, v7x 64 MiB physical per TC).
_TARGET_TILE_BYTES = 4 * 1024 * 1024
_VMEM_LIMIT_BYTES = 32 * 1024 * 1024


def _round_down_mult(n: int, m: int) -> int:
    return max(m, (n // m) * m)


def _choose_blocks(B: int, T: int, S: int, C: int,
                   sim_itemsize: int, hot_itemsize: int):
    """Pick (Bb, tT) tile sizes.

    tT is either the full extent T or a multiple of 8 (so the (8,128) rule is
    always satisfied), and the grid uses pl.cdiv so neither value needs to
    divide the array dims exactly.  The S axis is never tiled (softmax needs
    the full support row); for extremely long S an online-softmax variant
    would be required.
    """
    sim_row_bytes = S * sim_itemsize
    if T * sim_row_bytes <= _TARGET_TILE_BYTES:
        tT = T  # full extent: always a legal block size
    else:
        cap_t = max(8, _TARGET_TILE_BYTES // max(1, sim_row_bytes))
        tT = min(T, _round_down_mult(cap_t, 8))

    # Conservative per-batch-element byte estimate of the DMA'd tiles.
    per_b_bytes = (tT * S * sim_itemsize            # similarities tile
                   + S * C * hot_itemsize           # resident hots tile
                   + tT * C * 4)                    # f32 output tile
    Bb = max(1, min(B, _TARGET_TILE_BYTES // max(1, per_b_bytes)))

    # Never let the grid collapse to a single step when there is work to
    # split: v7x has 2 TensorCores and "parallel" semantics only help with
    # >= 2 grid steps.  No effect on v5e/v6e (1 TC).
    if pl.cdiv(B, Bb) == 1 and pl.cdiv(T, tT) == 1:
        if B > 1:
            Bb = (B + 1) // 2          # -> 2 steps along the batch axis
        elif T >= 16:
            tT = _round_down_mult(T // 2, 8)   # -> >= 2 steps along T
        # else: B == 1 and T < 16 — nothing worth splitting.

    return Bb, tT


def attn_kernel(sim_ref, hots_ref, out_ref):
    """One (Bb batch, tT target) tile per grid step.

    sim_ref : (Bb, tT, S)  VMEM tile (native input dtype)
    hots_ref: (Bb, S, C)   VMEM tile (native input dtype, resident across T)
    out_ref : (Bb, tT, C)  VMEM tile (f32)
    """
    s = sim_ref[...].astype(jnp.float32)                    # (Bb, tT, S)
    # Numerically-stable softmax numerator along the support axis.
    m = jnp.max(s, axis=-1, keepdims=True)                  # (Bb, tT, 1)
    e = jnp.exp(s - m)                                      # (Bb, tT, S)
    denom = jnp.sum(e, axis=-1, keepdims=True)              # (Bb, tT, 1)

    h = hots_ref[...].astype(jnp.float32)                   # (Bb, S, C)
    # Deferred normalization: matmul the un-normalized numerator, then scale
    # the (Bb, tT, C) result — T*C multiplies instead of T*S.
    acc = jnp.einsum("bts,bsc->btc", e, h,
                     preferred_element_type=jnp.float32)    # (Bb, tT, C)
    out_ref[...] = (acc * pl.reciprocal(denom, approx=False)).astype(out_ref.dtype)


def attn_forward(similarities: jax.Array, supports_hots: jax.Array) -> jax.Array:
    """similarities: [B, T, S], supports_hots: [B, S, C] -> [B, T, C] f32."""
    B, T, S = similarities.shape
    Bh, Sh, C = supports_hots.shape
    assert B == Bh and S == Sh, "batch / sequence dims must match"

    Bb, tT = _choose_blocks(
        B, T, S, C,
        sim_itemsize=similarities.dtype.itemsize,
        hot_itemsize=supports_hots.dtype.itemsize,
    )
    grid = (pl.cdiv(B, Bb), pl.cdiv(T, tT))

    return pl.pallas_call(
        attn_kernel,
        out_shape=jax.ShapeDtypeStruct((B, T, C), jnp.float32),
        grid_spec=pltpu.PrefetchScalarGridSpec(
            num_scalar_prefetch=0,
            grid=grid,
            in_specs=[
                # Similarities: tT is a multiple of 8 (or full extent),
                # S is the full extent -> (8,128) rule satisfied.
                pl.BlockSpec((Bb, tT, S), lambda b, t: (b, t, 0)),
                # One-hots: same block index across the t axis -> the tile
                # stays resident in VMEM while we sweep T.  S and C are full
                # extents, so no padding is needed anywhere.
                pl.BlockSpec((Bb, S, C), lambda b, t: (b, 0, 0)),
            ],
            # Output block's last dim C is the full extent (lane-sparse store
            # is a masked vst, far cheaper than 128/C x extra HBM bytes).
            out_specs=pl.BlockSpec((Bb, tT, C), lambda b, t: (b, t, 0)),
        ),
        compiler_params=pltpu.CompilerParams(
            dimension_semantics=("parallel", "parallel"),
            vmem_limit_bytes=_VMEM_LIMIT_BYTES,
        ),
    )(similarities, supports_hots)


def attn_reference(similarities: jax.Array, supports_hots: jax.Array) -> jax.Array:
    """Pure-JAX reference mirroring the PyTorch module."""
    p = jax.nn.softmax(similarities.astype(jnp.float32), axis=2)
    return jnp.einsum("bts,bsc->btc", p, supports_hots.astype(jnp.float32))


if __name__ == "__main__":
    # Small deterministic shapes consistent with the forward:
    # batch=2, target sequence length 8, support set length 16, 4 classes.
    B, T, S, C = 2, 8, 16, 4
    key = jax.random.PRNGKey(0)
    k_sim, k_lbl = jax.random.split(key)

    similarities = jax.random.normal(k_sim, (B, T, S), dtype=jnp.float32)
    support_labels = jax.random.randint(k_lbl, (B, S), 0, C)
    supports_hots = jax.nn.one_hot(support_labels, C, dtype=jnp.float32)

    out = attn_forward(similarities, supports_hots)
    out = jax.block_until_ready(out)

    ref = attn_reference(similarities, supports_hots)
    assert out.shape == (B, T, C), out.shape
    assert jnp.allclose(out, ref, atol=1e-5, rtol=1e-5), "mismatch vs reference"
    # each output row is a pdf over classes
    assert jnp.allclose(out.sum(-1), 1.0, atol=1e-5)

    print("KERNEL_OK")
</pallas_src>

<mosaic_0001>
module attributes {stable_mosaic.version = 11 : i64} {
  func.func @attn_kernel(%arg0: i32, %arg1: i32, %arg2: memref<1x8x16xf32, #tpu.memory_space<vmem>>, %arg3: memref<1x16x4xf32, #tpu.memory_space<vmem>>, %arg4: memref<1x8x4xf32, #tpu.memory_space<vmem>>) attributes {dimension_semantics = [#tpu.dimension_semantics<parallel>, #tpu.dimension_semantics<parallel>], iteration_bounds = array<i64: 2, 1>, scalar_prefetch = 0 : i64, scratch_operands = 0 : i64, tpu.core_type = #tpu.core_type<tc>, window_params = [{transform_indices = @transform_0, window_bounds = array<i64: 1, 8, 16>}, {transform_indices = @transform_1, window_bounds = array<i64: 1, 16, 4>}, {transform_indices = @transform_2, window_bounds = array<i64: 1, 8, 4>}]} {
    %c0 = arith.constant 0 : index
    %c0_0 = arith.constant 0 : index
    %c0_1 = arith.constant 0 : index
    %0 = vector.load %arg2[%c0, %c0_0, %c0_1] : memref<1x8x16xf32, #tpu.memory_space<vmem>>, vector<1x8x16xf32>
    %cst = arith.constant dense<0xFF800000> : vector<1x8xf32>
    %1 = vector.multi_reduction <maximumf>, %0, %cst [2] : vector<1x8x16xf32> to vector<1x8xf32>
    %2 = vector.shape_cast %1 : vector<1x8xf32> to vector<1x8x1xf32>
    %3 = vector.broadcast %2 : vector<1x8x1xf32> to vector<1x8x16xf32>
    %4 = arith.subf %0, %3 : vector<1x8x16xf32>
    %5 = math.exp %4 : vector<1x8x16xf32>
    %cst_2 = arith.constant dense<0.000000e+00> : vector<1x8xf32>
    %6 = vector.multi_reduction <add>, %5, %cst_2 [2] : vector<1x8x16xf32> to vector<1x8xf32>
    %7 = vector.shape_cast %6 : vector<1x8xf32> to vector<1x8x1xf32>
    %c0_3 = arith.constant 0 : index
    %c0_4 = arith.constant 0 : index
    %c0_5 = arith.constant 0 : index
    %8 = vector.load %arg3[%c0_3, %c0_4, %c0_5] : memref<1x16x4xf32, #tpu.memory_space<vmem>>, vector<1x16x4xf32>
    "tpu.trace_start"() <{level = 10 : i32, message = "bts,bsc->btc"}> : () -> ()
    %cst_6 = arith.constant dense<0.000000e+00> : vector<1x8x4xf32>
    %9 = tpu.matmul %5, %8, %cst_6 {dimension_numbers = #tpu.dot_dimension_numbers<[2], [1], [1], [2], [0, 0, 0, 1, 1, 2], [0], [0]>} : vector<1x8x16xf32>, vector<1x16x4xf32>, vector<1x8x4xf32> -> vector<1x8x4xf32>
    "tpu.trace_stop"() : () -> ()
    %10 = tpu.reciprocal %7 : vector<1x8x1xf32> -> vector<1x8x1xf32>
    %11 = vector.broadcast %10 : vector<1x8x1xf32> to vector<1x8x4xf32>
    %12 = arith.mulf %9, %11 : vector<1x8x4xf32>
    %c0_7 = arith.constant 0 : index
    %c0_8 = arith.constant 0 : index
    %c0_9 = arith.constant 0 : index
    %13 = vector.load %arg4[%c0_7, %c0_8, %c0_9] : memref<1x8x4xf32, #tpu.memory_space<vmem>>, vector<1x8x4xf32>
    tpu.vector_store %arg4[%c0_7, %c0_8, %c0_9], %12 {strides = array<i32>} : memref<1x8x4xf32, #tpu.memory_space<vmem>>, vector<1x8x4xf32>,
    return
  }
  func.func @transform_0(%arg0: i32, %arg1: i32) -> (i32, i32, i32) {
    %c0_i32 = arith.constant 0 : i32
    %c0_i32_0 = arith.constant 0 : i32
    return %arg0, %arg1, %c0_i32 : i32, i32, i32
  }
  func.func @transform_1(%arg0: i32, %arg1: i32) -> (i32, i32, i32) {
    %c0_i32 = arith.constant 0 : i32
    %c0_i32_0 = arith.constant 0 : i32
    %c0_i32_1 = arith.constant 0 : i32
    return %arg0, %c0_i32, %c0_i32_0 : i32, i32, i32
  }
  func.func @transform_2(%arg0: i32, %arg1: i32) -> (i32, i32, i32) {
    %c0_i32 = arith.constant 0 : i32
    %c0_i32_0 = arith.constant 0 : i32
    return %arg0, %arg1, %c0_i32 : i32, i32, i32
  }
}

</mosaic_0001>

<bundles_post_ra>
// kernel: tpu_custom_call.1
= control target key start
LH: loop header
LB: loop body
LE: loop exit
PB: predicated region body
PF: predicated region fallthrough
CT: control target
= control target key end

     0   :  { %s465_s9 = smov 0   ;;  %s467_s10 = smov 0   ;;  %s508_s0 = inlined_call_operand.vmem [shape: f32[2,8,16], index: 0, kind: input, shape index: {}]   ;;  %s509_s1 = inlined_call_operand.vmem [shape: f32[2,16,4], index: 1, kind: input, shape index: {}]   ;;  %s510_s2 = inlined_call_operand.vmem [shape: f32[2,8,4], index: 2, kind: output, shape index: {}]  }
   0x1   :  { %s469_s11 = smov 0  }
   0x2 LB: > { %s24_s12 = sadd.s32 1, %s441_s10  ;;  %p370_p0 = scmp.ge.s32.totalorder %s445_s11, 1  ;;  %s445_s11 = sphi %s469_s11, %s12_s11   ;;  %s441_s10 = sphi %s467_s10, %s512_s10   ;;  %s437_s9 = sphi %s465_s9, %s511_s9  }
   0x3   : > { %p26_p1 = scmp.ge.s32.totalorder %s24_s12, 2  ;;  %p140_p2 = scmp.lt.s32.totalorder %s445_s11, 3 }
   0x5   : > { %s514_s12 = smov (%p26_p1, %s24_s12), 0  ;;  %p141_p3 = pnand %p370_p0, %p140_p2 }
   0x6   : > { %p171_p4 = scmp.lt.s32.totalorder (!%p141_p3), %s437_s9, 1  ;;  %vm191_vm0 = vcmask (!%p141_p3), 130048   ;;  %v447_v2 = vmov (!%p141_p3), 0.0|0.0   ;;  %vm448_vm1 = vmmov (!%p141_p3), 0   ;;  %v449_v3 = vmov (!%p141_p3), 0.0  }
   0x7   : > { %144 = sbr.rel (%p141_p3) target bundleno = 391 (0x187), region = 28  ;;  %389 = vmatprep.subr.bf16.mxu0 (!%p141_p3), %v447_v2  ;;  %386 = vmatprep.mubr.msk.f32.mxu0 (!%p141_p3), %vm448_vm1, %v449_v3  ;;  %vm278_vm2 = vcmask (!%p141_p3), 31744  }
   0xe   : > { %s516_s9 = smov (!%p171_p4, %s437_s9), 1 }
   0xf   : > { %s371_s13 = sshll.u32 %s516_s9, 3  ;;  %s378_s17 = sshll.u32 %s516_s9, 4 }
  0x10   : > { %s177_s16 = scalar_lea.vmem %s508_s0, %s371_s13  ;;  %s182_s20 = scalar_lea.vmem %s509_s1, %s378_s17 }
  0x11   : > { %v190_v0 = vld [vmem:[%s177_s16] sm:$0xff]  ;;  %v202_v5 = vld [vmem:[%s182_s20 + $0x8] sm:$0xff]  ;;  %s189_s23 = scalar_lea.vmem %s510_s2, %s371_s13 }
  0x12   : > { %v192_v1 = vsel %vm191_vm0, %v190_v0, -inf  ;;  %v201_v4 = vld [vmem:[%s182_s20] sm:$0xff] }
  0x13   : > { %193 = vmax.xlane.f32.xlu0 %v192_v1  ;;  %v390_v6 = vpack.c.bf16 %v202_v5, %v201_v4 }
  0x15   : > { %391 = vmatpush3.bf16.msra.mxu0 %v390_v6 }
  0xa0   : > { %v194_v7 = vpop.xlane.xlu0 %193 }
  0xa1   : > { %v195_v8 = vsub.f32 %v190_v0, %v194_v7 }
  0xa3   : > { %v196_v9 = vmul.f32 1.442695, %v195_v8 }
  0xa5   : > { %419 = vpow2.f32 %v196_v9 }
  0xaf   : > { %v420_v10 = vpop.eup %419 }
  0xb0   : > { %387 = vmatmul.mubr.msk.f32.vlgmr.msra.gmra.mrb[0].mxu0 %vm191_vm0, %v420_v10  ;;  %v198_v11 = vsel %vm191_vm0, %v420_v10, 0.0 }
  0xb1   : > { %199 = vadd.xlane.f32.xlu0 %v198_v11 }
 0x13e   : > { %v200_v12 = vpop.xlane.xlu0 %199 }
 0x13f   : > { %421 = vrcp.f32 %v200_v12 }
 0x149   : > { %v422_v13 = vpop.eup %421 }
 0x183   : > { %v272_v14 = vpop.f32.mrb[0].mxu0 }
 0x184   : > { %v277_v15 = vmul.f32 %v422_v13, %v272_v14  ;;  %v388_v16 = vpop.f32.mrb[1].mxu0 }
 0x186   : > { %279 = vst.msk [vmem:[%s189_s23] sm:$0xff] %vm278_vm2, %v277_v15 }
 0x187 PF: > { %s12_s11 = sadd.s32 1, %s445_s11   ;;  %s511_s9 = smov %s441_s10 }
 0x188   : > { %p9_p5 = scmp.ge.s32.totalorder %s12_s11, 4   ;;  %s512_s10 = smov %s514_s12 }
 0x18a   :  { %11 = sbr.rel (!%p9_p5) target bundleno = 2 (0x2), region = 61 }

</bundles_post_ra>
